<compile_context>
chip_gen: v7x
topology: tpu7x:2x2x1
jax: 0.10.0
libtpu: 0.0.40
codegen_flags: <defaults>
</compile_context>

<pallas_src>
import jax
import jax.numpy as jnp
from jax import lax
from jax.experimental import pallas as pl
from jax.experimental.pallas import tpu as pltpu


def _se_kernel(x_ref, w1_ref, w2_ref, o_ref):
    # x_ref block: (Bb, C, HW); w1: (Cr, C); w2: (C, Cr)
    x = x_ref[...]
    xf = x.astype(jnp.float32)                                    # (Bb, C, HW)

    # Global average pool over spatial dims (f32 accumulation).
    pooled = jnp.mean(xf, axis=-1)                                # (Bb, C)

    # fc1 (no bias) + ReLU:  pooled @ w1.T  -> (Bb, Cr)
    h = lax.dot_general(pooled, w1_ref[...].astype(jnp.float32),
                        dimension_numbers=(((1,), (1,)), ((), ())),
                        preferred_element_type=jnp.float32)
    h = jnp.maximum(h, 0.0)

    # fc2 (no bias) + sigmoid:  h @ w2.T  -> (Bb, C)
    s = lax.dot_general(h, w2_ref[...].astype(jnp.float32),
                        dimension_numbers=(((1,), (1,)), ((), ())),
                        preferred_element_type=jnp.float32)
    s = jax.nn.sigmoid(s)                                         # (Bb, C)

    # Channel-wise rescale, broadcast over HW.
    o_ref[...] = (xf * s[:, :, None]).astype(o_ref.dtype)


def _pick_batch_block(B, C, HW, itemsize,
                      target_bytes=4 << 20, vmem_block_cap=6 << 20):
    """Largest per-step batch block that (a) keeps 4x block (double-buffered
    in+out) well under a 32 MiB VMEM budget, (b) leaves >=2 grid steps when
    B >= 2 (v7x megacore), and (c) divides B exactly (no ragged blocks)."""
    per_sample = max(1, C * HW * itemsize)
    cap = max(1, min(target_bytes, vmem_block_cap) // per_sample)
    if B >= 2:
        cap = min(cap, B // 2)           # keep at least 2 parallel grid steps
    cap = max(1, min(cap, B))
    for bb in range(cap, 0, -1):         # largest exact divisor of B <= cap
        if B % bb == 0:
            return bb
    return 1


def se_block(x, w1, w2):
    """x: (B, C, H, W); w1: (C//r, C); w2: (C, C//r)  (PyTorch Linear layout)."""
    B, C, H, W = x.shape
    Cr = w1.shape[0]
    HW = H * W
    x_flat = x.reshape(B, C, HW)

    bb = _pick_batch_block(B, C, HW, jnp.dtype(x.dtype).itemsize)
    grid = (B // bb,)

    out = pl.pallas_call(
        _se_kernel,
        out_shape=jax.ShapeDtypeStruct((B, C, HW), x.dtype),
        grid_spec=pltpu.PrefetchScalarGridSpec(
            num_scalar_prefetch=0,
            grid=grid,
            in_specs=[
                pl.BlockSpec((bb, C, HW), lambda b: (b, 0, 0)),
                # Weight blocks equal their full array dims -> legal layout;
                # constant index_map so they are fetched once and stay resident.
                pl.BlockSpec((Cr, C), lambda b: (0, 0)),
                pl.BlockSpec((C, Cr), lambda b: (0, 0)),
            ],
            out_specs=pl.BlockSpec((bb, C, HW), lambda b: (b, 0, 0)),
        ),
        # Alias x_flat (input 0) to the output: same shape/dtype, x is dead after.
        input_output_aliases={0: 0},
        compiler_params=pltpu.CompilerParams(
            dimension_semantics=("parallel",),
            vmem_limit_bytes=32 * 1024 * 1024,
        ),
    )(x_flat, w1, w2)
    return out.reshape(B, C, H, W)


def se_block_ref(x, w1, w2):
    """Plain-JAX reference matching the PyTorch module."""
    pooled = jnp.mean(x, axis=(2, 3))                 # (B, C)
    h = jnp.maximum(pooled @ w1.T, 0.0)               # (B, C//r)
    s = jax.nn.sigmoid(h @ w2.T)                      # (B, C)
    return x * s[:, :, None, None]


if __name__ == "__main__":
    # Shapes consistent with SEBlock(ch=16, reduction=8)
    B, C, H, W = 2, 16, 16, 16
    reduction = 8
    Cr = C // reduction

    key = jax.random.PRNGKey(0)
    kx, k1, k2 = jax.random.split(key, 3)
    x = jax.random.normal(kx, (B, C, H, W), dtype=jnp.float32)
    # Deterministic synthetic weights in PyTorch Linear layout (out, in)
    w1 = jax.random.normal(k1, (Cr, C), dtype=jnp.float32) * (1.0 / jnp.sqrt(C))
    w2 = jax.random.normal(k2, (C, Cr), dtype=jnp.float32) * (1.0 / jnp.sqrt(Cr))

    out = jax.block_until_ready(se_block(x, w1, w2))
    ref = se_block_ref(x, w1, w2)
    assert jnp.allclose(out, ref, atol=1e-5, rtol=1e-5), "mismatch vs reference"
    print("KERNEL_OK")
</pallas_src>

<mosaic_0001>
module attributes {stable_mosaic.version = 11 : i64} {
  func.func @_se_kernel(%arg0: i32, %arg1: memref<1x16x256xf32, #tpu.memory_space<vmem>>, %arg2: memref<2x16xf32, #tpu.memory_space<vmem>>, %arg3: memref<16x2xf32, #tpu.memory_space<vmem>>, %arg4: memref<1x16x256xf32, #tpu.memory_space<vmem>>) attributes {dimension_semantics = [#tpu.dimension_semantics<parallel>], iteration_bounds = array<i64: 2>, scalar_prefetch = 0 : i64, scratch_operands = 0 : i64, tpu.core_type = #tpu.core_type<tc>, window_params = [{transform_indices = @transform_0, window_bounds = array<i64: 1, 16, 256>}, {pipeline_mode = #tpu.pipeline_mode<synchronous>, transform_indices = @transform_1, window_bounds = array<i64: 2, 16>}, {pipeline_mode = #tpu.pipeline_mode<synchronous>, transform_indices = @transform_2, window_bounds = array<i64: 16, 2>}, {transform_indices = @transform_3, window_bounds = array<i64: 1, 16, 256>}]} {
    %c0 = arith.constant 0 : index
    %c0_0 = arith.constant 0 : index
    %c0_1 = arith.constant 0 : index
    %0 = vector.load %arg1[%c0, %c0_0, %c0_1] : memref<1x16x256xf32, #tpu.memory_space<vmem>>, vector<1x16x256xf32>
    %cst = arith.constant dense<0.000000e+00> : vector<1x16xf32>
    %1 = vector.multi_reduction <add>, %0, %cst [2] : vector<1x16x256xf32> to vector<1x16xf32>
    %cst_2 = arith.constant 2.560000e+02 : f32
    %2 = vector.broadcast %cst_2 : f32 to vector<1x16xf32>
    %3 = arith.divf %1, %2 : vector<1x16xf32>
    %c0_3 = arith.constant 0 : index
    %c0_4 = arith.constant 0 : index
    %4 = vector.load %arg2[%c0_3, %c0_4] : memref<2x16xf32, #tpu.memory_space<vmem>>, vector<2x16xf32>
    %cst_5 = arith.constant dense<0.000000e+00> : vector<1x2xf32>
    %5 = tpu.matmul %3, %4, %cst_5 {dimension_numbers = #tpu.dot_dimension_numbers<[1], [1], [0], [0], [0, 0, 1, 0], [], []>} : vector<1x16xf32>, vector<2x16xf32>, vector<1x2xf32> -> vector<1x2xf32>
    %cst_6 = arith.constant 0.000000e+00 : f32
    %6 = vector.broadcast %cst_6 : f32 to vector<1x2xf32>
    %7 = arith.maximumf %5, %6 : vector<1x2xf32>
    %c0_7 = arith.constant 0 : index
    %c0_8 = arith.constant 0 : index
    %8 = vector.load %arg3[%c0_7, %c0_8] : memref<16x2xf32, #tpu.memory_space<vmem>>, vector<16x2xf32>
    %cst_9 = arith.constant dense<0.000000e+00> : vector<1x16xf32>
    %9 = tpu.matmul %7, %8, %cst_9 {dimension_numbers = #tpu.dot_dimension_numbers<[1], [1], [0], [0], [0, 0, 1, 0], [], []>} : vector<1x2xf32>, vector<16x2xf32>, vector<1x16xf32> -> vector<1x16xf32>
    %10 = arith.negf %9 : vector<1x16xf32>
    %11 = math.exp %10 : vector<1x16xf32>
    %cst_10 = arith.constant 1.000000e+00 : f32
    %12 = vector.broadcast %cst_10 : f32 to vector<1x16xf32>
    %13 = arith.addf %12, %11 : vector<1x16xf32>
    %14 = arith.divf %12, %13 : vector<1x16xf32>
    %15 = vector.shape_cast %14 : vector<1x16xf32> to vector<1x16x1xf32>
    %16 = vector.broadcast %15 : vector<1x16x1xf32> to vector<1x16x256xf32>
    %17 = arith.mulf %0, %16 : vector<1x16x256xf32>
    %c0_11 = arith.constant 0 : index
    %c0_12 = arith.constant 0 : index
    %c0_13 = arith.constant 0 : index
    %18 = vector.load %arg4[%c0_11, %c0_12, %c0_13] : memref<1x16x256xf32, #tpu.memory_space<vmem>>, vector<1x16x256xf32>
    tpu.vector_store %arg4[%c0_11, %c0_12, %c0_13], %17 {strides = array<i32>} : memref<1x16x256xf32, #tpu.memory_space<vmem>>, vector<1x16x256xf32>,
    return
  }
  func.func @transform_0(%arg0: i32) -> (i32, i32, i32) {
    %c0_i32 = arith.constant 0 : i32
    %c0_i32_0 = arith.constant 0 : i32
    %c0_i32_1 = arith.constant 0 : i32
    return %arg0, %c0_i32, %c0_i32_0 : i32, i32, i32
  }
  func.func @transform_1(%arg0: i32) -> (i32, i32) {
    %c0_i32 = arith.constant 0 : i32
    %c0_i32_0 = arith.constant 0 : i32
    %c0_i32_1 = arith.constant 0 : i32
    return %c0_i32, %c0_i32_0 : i32, i32
  }
  func.func @transform_2(%arg0: i32) -> (i32, i32) {
    %c0_i32 = arith.constant 0 : i32
    %c0_i32_0 = arith.constant 0 : i32
    %c0_i32_1 = arith.constant 0 : i32
    return %c0_i32, %c0_i32_0 : i32, i32
  }
  func.func @transform_3(%arg0: i32) -> (i32, i32, i32) {
    %c0_i32 = arith.constant 0 : i32
    %c0_i32_0 = arith.constant 0 : i32
    %c0_i32_1 = arith.constant 0 : i32
    return %arg0, %c0_i32, %c0_i32_0 : i32, i32, i32
  }
}

</mosaic_0001>

<bundles_post_ra>
// kernel: tpu_custom_call.1
= control target key start
LH: loop header
LB: loop body
LE: loop exit
PB: predicated region body
PF: predicated region fallthrough
CT: control target
= control target key end

     0   :  { %8 = vsyncpa [#allocation3], 0  ;;  %s904_s0 = inlined_call_operand.hbm [shape: f32[2,16,256], index: 0, kind: input, shape index: {}, may-alias: {0,3}]   ;;  %s905_s1 = inlined_call_operand.vmem [shape: f32[2,16], index: 1, kind: input, shape index: {}]   ;;  %s906_s2 = inlined_call_operand.vmem [shape: f32[16,2], index: 2, kind: input, shape index: {}]   ;;  %s907_s3 = inlined_call_operand.hbm [shape: f32[2,16,256], index: 3, kind: output, shape index: {}, may-alias: {0,3}]  }
   0x1   :  { %10 = vsyncpa [#allocation3 + $0x1], 0 }
   0x2   :  { %11 = vsyncpa [#allocation4], 0 }
   0x3   :  { %13 = vsyncpa [#allocation4 + $0x1], 0  ;;  %s716_s12 = smov 0   ;;  %s718_s13 = smov 0  }
   0x4   :  { %s720_s14 = smov 0   ;;  %s722_s15 = smov 0  }
   0x5 LB: > { %s737_s16 = sadd.s32 4294967295, %s685_s15   ;;  %s489_s17 = sadd.s32 4294967294, %s685_s15   ;;  %s685_s15 = sphi %s722_s15, %s920_s15   ;;  %s681_s14 = sphi %s720_s14, %s919_s14   ;;  %s677_s13 = sphi %s718_s13, %s918_s13   ;;  %s673_s12 = sphi %s716_s12, %s917_s12  }
   0x6   : > { %s741_s18 = sadd.s32 1, %s685_s15   ;;  %s26_s19 = sadd.s32 1, %s681_s14 }
   0x7   : > { %s23_s20 = ssub.s32 %s685_s15, %s741_s18  ;;  %p33_p0 = scmp.ne.s32.totalorder %s681_s14, %s677_s13 }
   0x8   : > { %p24_p1 = scmp.eq.s32.totalorder %s23_s20, 0  ;;  %p34_p2 = scmp.eq.s32.totalorder %s685_s15, 0 }
   0x9   : > { %p39_p3 = scmp.ne.s32.totalorder %s677_s13, %s673_s12  ;;  %p40_p4 = scmp.eq.s32.totalorder %s737_s16, 0 }
   0xa   : > { %s753_s21 = scalar_select %p24_p1, %s681_s14, %s26_s19  }
   0xb   : > { %p755_p5 = por %p34_p2, %p33_p0  ;;  %p759_p6 = por %p40_p4, %p39_p3 }
   0xc   : > { %p105_p7 = scmp.eq.s32.totalorder %s737_s16, 1  ;;  %p111_p8 = scmp.eq.s32.totalorder %s489_s17, 1 }
   0xd   : > { %p544_p10 = scmp.lt.s32.totalorder %s685_s15, 2  ;;  %s137_s26 = sand.u32 1, %s681_s14  }
   0xe   : > { %p766_p11 = por %p105_p7, %p33_p0  ;;  %p770_p12 = por %p111_p8, %p39_p3 }
   0xf   : > { %s509_s27 = sshll.u32 %s685_s15, 9  ;;  %s492_s28 = sshll.u32 %s137_s26, 5 }
  0x10   : > { %s911_s24 = scalar_select %p766_p11, 1, 0 }
  0x11   : > { %s912_s25 = scalar_select %p770_p12, 1, 0 }
  0x12   : > { %s779_s4 = scalar_lea.hbm %s904_s0, %s509_s27  ;;  %s141_s5 = scalar_lea.vmem [#allocation2], %s492_s28 }
  0x13   : > { %s148_s6 = sshll.u32 %s141_s5, 4  ;;  %p783_p13 = pnand %p544_p10, %p755_p5  ;;  %s787_s6 = int_to_ptr.vmem [resolvable:$true] %s148_s6 }
  0x14   : > { %s789_s8 = scalar_lea.sflag [#allocation3], %s137_s26  ;;  %s589_s9 = scalar_lea.hbm %s779_s4, 512 }
  0x15   : > { %p590_p0 = scmp.ne.s32.totalorder %s779_s4, %s589_s9  ;;  %p591_p1 = pneg %p783_p13 }
  0x16   : > { %s594_s17 = scalar_lea.hbm %s904_s0, 1024  ;;  %p595_p4 = scmp.lt.u32.totalorder %s779_s4, %s904_s0 }
  0x17   : > { %p592_p2 = pnand %p591_p1, %p590_p0  ;;  %p596_p5 = scmp.lt.u32.totalorder %s594_s17, %s589_s9 }
  0x18   : > { %p598_p8 = scmp.lt.u32.totalorder %s589_s9, %s779_s4 }
  0x19   : > { %p593_p3 = pneg %p592_p2  ;;  %p597_p7 = por %p596_p5, %p595_p4 }
  0x1b   : > { %p599_p10 = por %p598_p8, %p597_p7 }
  0x1d   : > { %p600_p9 = pnand %p599_p10, %p593_p3 }
  0x1f   : > { %603 = shalt.err (!%p600_p9)
}
  0x20   : > { %s604_s22 = scalar_lea.vmem %s787_s6, 512  ;;  %s687_s26 = smov [#allocation2]  }
  0x21   : > { %p605_p0 = scmp.ne.s32.totalorder %s787_s6, %s604_s22  ;;  %s609_s27 = sshll.u32 %s687_s26, 4  ;;  %s610_s27 = int_to_ptr.vmem [resolvable:$false] %s609_s27 }
  0x22   : > { %s611_s28 = scalar_lea.vmem %s610_s27, 1024  ;;  %p612_p11 = scmp.lt.s32.totalorder %s787_s6, %s610_s27 }
  0x23   : > { %p607_p2 = pnand %p605_p0, %p591_p1  ;;  %p613_p4 = scmp.lt.s32.totalorder %s611_s28, %s604_s22 }
  0x25   : > { %p608_p12 = pneg %p607_p2  ;;  %p614_p5 = por %p613_p4, %p612_p11 }
  0x27   : > { %p615_p7 = pnand %p614_p5, %p608_p12 }
  0x29   : > { %618 = shalt.err (!%p615_p7)
}
  0x2a   : > { %s688_s29 = smov 256   ;;  %s689_s30 = smov 16  }
  0x2b   : > { %539 = dma.hbm_to_vmem [thread:$0]  (!%p783_p13), %s779_s4, 512, %s787_s6, %s789_s8, %s688_s29, %s688_s29, %s689_s30  }
  0x2c   : > { %p495_p9 = scmp.ge.s32.totalorder %s685_s15, 1  ;;  %p156_p1 = scmp.lt.s32.totalorder %s685_s15, 3 }
  0x2e   : > { %p157_p3 = pnand %p495_p9, %p156_p1 }
  0x2f   : > { %s820_s5 = sand.u32 (!%p157_p3), 1, %s677_s13  }
  0x30   : > { %160 = sbr.rel (%p157_p3) target bundleno = 800 (0x320), region = 32  ;;  %s496_s9 = sshll.u32 (!%p157_p3), %s820_s5, 5 }
  0x31   : > { %s163_s10 = scalar_lea.sflag (!%p157_p3), [#allocation3], %s820_s5  ;;  %s166_s11 = scalar_lea.vmem (!%p157_p3), [#allocation2], %s496_s9 }
  0x37   : > { %664 = dma.done.wait (%p759_p6), %s163_s10, 512  }
  0x38   : > { %666 = vsyncadd (%p759_p6), %s163_s10, 4294966784  ;;  %v189_v0 = vld [vmem:[%s166_s11] sm:$0xff]  ;;  %v190_v1 = vld [vmem:[%s166_s11 + $0x8] sm:$0xff]  ;;  %v690_v6 = vmov 0.0   ;;  %vm218_vm0 = vcmask 130048   ;;  %vm691_vm1 = vmmov 0   ;;  %v205_v12 = vlaneseq }
  0x39   : > { %v830_v2 = vld [vmem:[%s166_s11 + $0x10] sm:$0xff]  ;;  %v193_v3 = vadd.f32 %v190_v1, %v189_v0  ;;  %v832_v4 = vld [vmem:[%s166_s11 + $0x18] sm:$0xff]  ;;  %516 = vmatprep.subr.mxu0 %v690_v6  ;;  %v202_v7 = vld [vmem:[%s905_s1] sm:$0x3]  ;;  %518 = vmatprep.mubr.msk.f32.mxu0 %vm691_vm1, %v690_v6  ;;  %vm297_vm2 = vcmask 15360   ;;  %v692_v10 = vmov 0.0|0.0  }
  0x3a   : > { %v196_v5 = vadd.f32 %v832_v4, %v830_v2  ;;  %517 = vmatpush3.xpose.msk.msra.mxu0 %vm218_vm0, %v202_v7  ;;  %525 = vmatprep.mubr.msk.f32.mxu1 %vm691_vm1, %v690_v6  ;;  %v295_v8 = vld [vmem:[%s906_s2] sm:$0xff]  ;;  %v296_v9 = vld [vmem:[%s906_s2 + $0x8] sm:$0xff]  ;;  %vm530_vm3 = vmpackc.low %vm297_vm2, %vm297_vm2  ;;  %v206_v13 = vand.u32 127, %v205_v12  ;;  %v208_v14 = vshrl.u32 %v205_v12, 7  ;;  %vm216_vm4 = vcmask 130112   ;;  %s188_s19 = scalar_lea.vmem [#allocation5], %s496_s9 }
  0x3b   : > { %194 = vadd.xlane.f32.xlu0 %v193_v3  ;;  %528 = vmatprep.subr.bf16.mxu1 %v692_v10  ;;  %v529_v11 = vpack.c.bf16 %v296_v9, %v295_v8  ;;  %s416_s20 = sshll.u32 %s188_s19, 4  ;;  %s510_s22 = sshll.u32 %s737_s16, 9  ;;  %s853_s20 = int_to_ptr.vmem [resolvable:$true] %s416_s20 }
  0x3c   : > { %v211_v15 = vadd.s32 4294967288, %v206_v13  ;;  %v209_v17 = vsub.s32 %v206_v13, %v208_v14  ;;  %v385_v33 = vsub.s32 0, %v208_v14  ;;  %s858_s28 = scalar_lea.hbm %s907_s3, %s510_s22  ;;  %s403_s16 = scalar_lea.sflag [#allocation4], %s820_s5 }
  0x3d   : > { %531 = vmatpush3.bf16.xpose.msk.msra.mxu1 %vm530_vm3, %v529_v11  ;;  %s619_s29 = scalar_lea.vmem %s853_s20, 512  ;;  %p914_p11 = scmp.ne.s32.totalorder %s911_s24, 0 }
  0x3e   : > { %v214_v19 = vsub.s32 %v211_v15, %v208_v14  ;;  %p620_p6 = scmp.ne.s32.totalorder %s853_s20, %s619_s29  ;;  %s693_s30 = smov [#allocation5]  }
  0x3f   : > { %197 = vadd.xlane.f32.xlu0 %v196_v5  ;;  %s623_s9 = sshll.u32 %s693_s30, 4  ;;  %s624_s9 = int_to_ptr.vmem [resolvable:$false] %s623_s9 }
  0x40   : > { %p621_p12 = pnand %p620_p6, %p914_p11  ;;  %s625_s10 = scalar_lea.vmem %s624_s9, 1024 }
  0x41   : > { %p626_p8 = scmp.lt.s32.totalorder %s853_s20, %s624_s9  ;;  %p627_p10 = scmp.lt.s32.totalorder %s625_s10, %s619_s29 }
  0x42   : > { %p622_p13 = pneg %p621_p12 }
  0x43   : > { %p628_p0 = por %p627_p10, %p626_p8 }
  0x45   : > { %p629_p2 = pnand %p628_p0, %p622_p13 }
  0xc8   : > { %v195_v16 = vpop.xlane.xlu0 %194 }
  0xc9   : > { %v200_v18 = vmul.f32 0.00390625, %v195_v16 }
  0xcb   : > { %v210_v22 = vrot.slane %v200_v18, %v209_v17 }
  0xcc   : > { %v198_v20 = vpop.xlane.xlu0 %197 }
  0xcd   : > { %v201_v21 = vmul.f32 0.00390625, %v198_v20 }
  0xcf   : > { %v215_v23 = vrot.slane %v201_v21, %v214_v19 }
  0xd1   : > { %v217_v24 = vsel %vm216_vm4, %v215_v23, %v210_v22 }
  0xd2   : > { %519 = vmatmul.mubr.msk.f32.vlgmr.msra.gmra.mrb[0].mxu0 %vm218_vm0, %v217_v24 }
 0x1a5   : > { %v290_v25 = vpop.f32.mrb[0].mxu0 }
 0x1a6   : > { %v294_v26 = vmax.f32 %v290_v25, 0.0  ;;  %v520_v27 = vpop.f32.mrb[1].mxu0 }
 0x1a8   : > { %526 = vmatmul.mubr.msk.f32.vlgmr.msra.gmra.mrb[0].mxu1 %vm297_vm2, %v294_v26 }
 0x27b   : > { %v373_v28 = vpop.f32.mrb[0].mxu1 }
 0x27c   : > { %v503_v29 = vmul.f32 -1.442695, %v373_v28  ;;  %v527_v30 = vpop.f32.mrb[1].mxu1 }
 0x27e   : > { %585 = vpow2.f32 %v503_v29 }
 0x288   : > { %v586_v31 = vpop.eup %585 }
 0x289   : > { %v380_v32 = vadd.f32 1.0, %v586_v31 }
 0x28b   : > { %587 = vrcp.f32 %v380_v32 }
 0x295   : > { %v588_v34 = vpop.eup %587 }
 0x296   : > { %v386_v35 = vrot.slane %v588_v34, %v385_v33 }
 0x298   : > { %388 = vbcast.lane.b32.xlu1 %v386_v35, 256 }
 0x29c   : > { %392 = vbcast.lane.b32.xlu1 %v386_v35, 264 }
 0x30a   : > { %v389_v36 = vpop.permute.xlu1 %388 }
 0x30b   : > { %v394_v37 = vmul.f32 %v389_v36, %v189_v0  ;;  %v395_v38 = vmul.f32 %v389_v36, %v190_v1 }
 0x30d   : > { %398 = vst [vmem:[%s188_s19] sm:$0xff] %v394_v37  ;;  %399 = vst [vmem:[%s188_s19 + $0x8] sm:$0xff] %v395_v38 }
 0x30e   : > { %v393_v39 = vpop.permute.xlu1 %392 }
 0x30f   : > { %v396_v40 = vmul.f32 %v393_v39, %v830_v2  ;;  %v397_v41 = vmul.f32 %v393_v39, %v832_v4 }
 0x311   : > { %400 = vst [vmem:[%s188_s19 + $0x10] sm:$0xff] %v396_v40  ;;  %401 = vst [vmem:[%s188_s19 + $0x18] sm:$0xff] %v397_v41 }
 0x312   : > { %632 = shalt.err (!%p629_p2)
}
 0x313   : > { %s633_s11 = scalar_lea.hbm %s858_s28, 512  ;;  %s637_s23 = scalar_lea.hbm %s907_s3, 1024 }
 0x314   : > { %p634_p4 = scmp.ne.s32.totalorder %s858_s28, %s633_s11  ;;  %p638_p9 = scmp.lt.u32.totalorder %s858_s28, %s907_s3 }
 0x315   : > { %p639_p1 = scmp.lt.u32.totalorder %s637_s23, %s633_s11  ;;  %p641_p6 = scmp.lt.u32.totalorder %s633_s11, %s858_s28 }
 0x316   : > { %p635_p5 = pnand %p634_p4, %p914_p11 }
 0x317   : > { %p640_p3 = por %p639_p1, %p638_p9 }
 0x318   : > { %p636_p7 = pneg %p635_p5 }
 0x319   : > { %p642_p12 = por %p641_p6, %p640_p3 }
 0x31b   : > { %p643_p13 = pnand %p642_p12, %p636_p7 }
 0x31d   : > { %646 = shalt.err (!%p643_p13)
}
 0x31e   : > { %s694_s17 = smov 256   ;;  %s695_s19 = smov 16  }
 0x31f   : > { %534 = dma.vmem_to_hbm [thread:$0]  (%p914_p11), %s853_s20, 512, %s858_s28, %s403_s16, %s694_s17, %s694_s17, %s695_s19  }
 0x320 PF: > { %s431_s22 = sand.u32 1, %s673_s12   ;;  %p915_p8 = scmp.ne.s32.totalorder %s912_s25, 0 }
 0x321   : > { %p916_p10 = scmp.ge.s32.totalorder %s685_s15, 2  ;;  %s432_s26 = scalar_lea.sflag [#allocation4], %s431_s22 }
 0x323   : > { %p541_p0 = pnand %p916_p10, %p915_p8 }
 0x325   : > { %668 = dma.done.wait (!%p541_p0), %s432_s26, 512  }
 0x326   : > { %670 = vsyncadd (!%p541_p0), %s432_s26, 4294966784  ;;  %p16_p2 = scmp.ge.s32.totalorder %s741_s18, 4   ;;  %s917_s12 = smov %s677_s13 }
 0x327   : > { %s918_s13 = smov %s681_s14  ;;  %s919_s14 = smov %s753_s21 }
 0x328   : > { %s920_s15 = smov %s741_s18  ;;  %18 = sbr.rel (!%p16_p2) target bundleno = 5 (0x5), region = 77 }
 0x32f   :  { %437 = vsyncpa [#allocation3], 1 }
 0x330   :  { %439 = vsyncpa [#allocation3 + $0x1], 1 }
 0x331   :  { %440 = vsyncpa [#allocation4], 1 }
 0x332   :  { %442 = vsyncpa [#allocation4 + $0x1], 1 }

</bundles_post_ra>
